<compile_context>
chip_gen: v5e
topology: v5e:2x2
jax: 0.10.0
libtpu: 0.0.40
codegen_flags: <defaults>
</compile_context>

<pallas_src>
import functools

import jax
import jax.numpy as jnp
from jax.experimental import pallas as pl
from jax.experimental.pallas import tpu as pltpu

LANE = 128                         # vreg lane width
TM_MAX = 4096                      # rows per tile -> 4096*128*4B = 2 MiB f32
VMEM_LIMIT = 32 * 1024 * 1024      # explicit scoped-VMEM cap (v5e default is 16 MiB)
FUSED_PAD_BYTES = 2 * 1024 * 1024  # fused path cutoff on tile-padded f32 footprint


def _cdiv(a, b):
    return -(-a // b)


def _round_up(a, b):
    return _cdiv(a, b) * b


def _smem_spec():
    return pl.BlockSpec(memory_space=pltpu.MemorySpace.SMEM)


def _vmem_whole_spec():
    return pl.BlockSpec(memory_space=pltpu.MemorySpace.VMEM)


@functools.lru_cache(maxsize=1)
def _grid_cores():
    """How many TensorCores a single program can shard a 'parallel' axis over."""
    try:
        kind = jax.devices()[0].device_kind.lower()
    except Exception:  # pragma: no cover - defensive
        return 1
    # v4 / v5p (megacore) and v7x expose 2 TensorCores per chip to one program;
    # v5e / v6e (and older v2/v3 per-device) are effectively single-core here.
    return 2 if any(tag in kind for tag in ("v4", "v5p", "v7")) else 1


def _padded_f32_bytes(shape):
    """Tile-padded f32 footprint of the original-shape array (fused-path gate)."""
    if len(shape) < 2:
        return None
    lead = 1
    for d in shape[:-2]:
        lead *= d
    return lead * _round_up(shape[-2], 8) * _round_up(shape[-1], LANE) * 4


# --------------------------------------------------------------------------
# Fused single-kernel path (whole array resident in VMEM)
# --------------------------------------------------------------------------
def _fused_train_kernel(w_ref, b_ref, x_ref, o_ref, mean_ref, var_ref, *, n, eps):
    x = x_ref[...].astype(jnp.float32)
    n_f = jnp.float32(n)
    mean = jnp.sum(x) / n_f
    # TODO(synk): E[x^2]-mean^2 can lose digits when |mean| >> std; a Welford /
    #             Chan merge would be safer for offset-heavy data.
    biased_var = jnp.maximum(jnp.sum(x * x) / n_f - mean * mean, 0.0)
    inv_std = jax.lax.rsqrt(biased_var + jnp.float32(eps))
    scale = inv_std * w_ref[0, 0]
    shift = b_ref[0, 0] - mean * scale
    o_ref[...] = (x * scale + shift).astype(o_ref.dtype)
    mean_ref[0, 0] = mean
    var_ref[0, 0] = biased_var


def _affine_whole_kernel(scale_ref, shift_ref, x_ref, o_ref):
    x = x_ref[...].astype(jnp.float32)
    o_ref[...] = (x * scale_ref[0, 0] + shift_ref[0, 0]).astype(o_ref.dtype)


def _fused_train(x, w, b, n, eps):
    as_s = lambda v: jnp.asarray(v, jnp.float32).reshape(1, 1)
    out, mean11, bvar11 = pl.pallas_call(
        functools.partial(_fused_train_kernel, n=n, eps=float(eps)),
        out_shape=(jax.ShapeDtypeStruct(x.shape, x.dtype),
                   jax.ShapeDtypeStruct((1, 1), jnp.float32),
                   jax.ShapeDtypeStruct((1, 1), jnp.float32)),
        in_specs=[_smem_spec(), _smem_spec(), _vmem_whole_spec()],
        out_specs=(_vmem_whole_spec(), _smem_spec(), _smem_spec()),
        compiler_params=pltpu.CompilerParams(vmem_limit_bytes=VMEM_LIMIT),
    )(as_s(w), as_s(b), x)
    return out, mean11[0, 0], bvar11[0, 0]


def _fused_affine(x, scale, shift):
    as_s = lambda v: jnp.asarray(v, jnp.float32).reshape(1, 1)
    return pl.pallas_call(
        _affine_whole_kernel,
        out_shape=jax.ShapeDtypeStruct(x.shape, x.dtype),
        in_specs=[_smem_spec(), _smem_spec(), _vmem_whole_spec()],
        out_specs=_vmem_whole_spec(),
        compiler_params=pltpu.CompilerParams(vmem_limit_bytes=VMEM_LIMIT),
    )(as_s(scale), as_s(shift), x)


# --------------------------------------------------------------------------
# 2-pass path for large tensors.  Pass 1: global sum(x) and sum(x*x)
# --------------------------------------------------------------------------
def _reduce_kernel(x_ref, sum_ref, sq_ref, *, tm, bpc, rows_arr, any_ragged):
    """Accumulate lane-partial sum / sumsq into the resident (8,128) outputs."""
    i = pl.program_id(1)   # reduction ("arbitrary") axis

    @pl.when(i == 0)
    def _():
        sum_ref[...] = jnp.zeros_like(sum_ref)
        sq_ref[...] = jnp.zeros_like(sq_ref)

    x = x_ref[...].astype(jnp.float32)          # (tm, LANE), in-register upcast

    def _acc(xv):
        # Fold tm rows onto the 8-sublane accumulator with elementwise adds.
        part = xv.reshape(tm // 8, 8, LANE)
        sum_ref[...] += part.sum(axis=0)
        sq_ref[...] += (part * part).sum(axis=0)

    if any_ragged:
        # Logical block id (before the index_map clamp); blocks that extend
        # past the real array see stale VMEM rows -> mask them to zero.
        blk = pl.program_id(0) * bpc + i
        is_ragged = (blk + 1) * tm > rows_arr

        @pl.when(is_ragged)
        def _():
            rows = jax.lax.broadcasted_iota(jnp.int32, (tm, LANE), 0)
            valid = (blk * tm + rows) < rows_arr
            _acc(jnp.where(valid, x, 0.0))

        @pl.when(jnp.logical_not(is_ragged))
        def _():
            _acc(x)
    else:
        _acc(x)


def _global_sums(x2d, rows_arr, tm):
    """Return (sum(x), sum(x*x)) over the (rows_arr, LANE) slab (pad is 0)."""
    nblk = _cdiv(rows_arr, tm)
    nc = _grid_cores() if nblk >= 2 else 1   # 2 only on 2-TC chips (v4/v5p/v7x)
    bpc = _cdiv(nblk, nc)                    # blocks per core
    any_ragged = nc * bpc * tm > rows_arr

    kernel = functools.partial(_reduce_kernel, tm=tm, bpc=bpc,
                               rows_arr=rows_arr, any_ragged=any_ragged)

    # Clamp so phantom blocks never generate an out-of-bounds DMA; their
    # (duplicated) data is zeroed by the in-kernel mask.
    x_map = lambda c, i: (jnp.minimum(c * bpc + i, nblk - 1), 0)

    sums, sqs = pl.pallas_call(
        kernel,
        out_shape=(jax.ShapeDtypeStruct((nc * 8, LANE), jnp.float32),
                   jax.ShapeDtypeStruct((nc * 8, LANE), jnp.float32)),
        grid=(nc, bpc),
        in_specs=[pl.BlockSpec((tm, LANE), x_map)],
        out_specs=(pl.BlockSpec((8, LANE), lambda c, i: (c, 0)),
                   pl.BlockSpec((8, LANE), lambda c, i: (c, 0))),
        compiler_params=pltpu.CompilerParams(
            dimension_semantics=("parallel", "arbitrary"),
            vmem_limit_bytes=VMEM_LIMIT),
    )(x2d)
    # Tiny final reduction of the lane partials in plain JAX.
    return jnp.sum(sums), jnp.sum(sqs)


# --------------------------------------------------------------------------
# Pass 2: out = x * scale + shift  (affine pre-folded in the wrapper)
# --------------------------------------------------------------------------
def _norm_kernel(scale_ref, shift_ref, x_ref, o_ref):
    x = x_ref[...].astype(jnp.float32)
    o_ref[...] = (x * scale_ref[0, 0] + shift_ref[0, 0]).astype(o_ref.dtype)


def _normalize(x2d, rows_arr, tm, scale, shift, out_dtype):
    nblk = _cdiv(rows_arr, tm)
    as_s = lambda v: jnp.asarray(v, jnp.float32).reshape(1, 1)
    return pl.pallas_call(
        _norm_kernel,
        out_shape=jax.ShapeDtypeStruct((rows_arr, LANE), out_dtype),
        grid=(nblk,),
        in_specs=[_smem_spec(), _smem_spec(),
                  pl.BlockSpec((tm, LANE), lambda i: (i, 0))],
        out_specs=pl.BlockSpec((tm, LANE), lambda i: (i, 0)),
        compiler_params=pltpu.CompilerParams(
            dimension_semantics=("parallel",),
            vmem_limit_bytes=VMEM_LIMIT),
    )(as_s(scale), as_s(shift), x2d)


def _to_slab(x, n):
    """Flatten to a lane-dense (rows, 128) slab for the 2-pass path."""
    rows_eff = _cdiv(n, LANE)
    if rows_eff >= TM_MAX:
        tm = TM_MAX
        rows_arr = rows_eff
    else:
        rows_arr = max(_round_up(rows_eff, 8), 8)   # keep tm % 8 == 0
        tm = rows_arr
    padded_len = rows_arr * LANE
    flat = x.reshape(-1)                 # keep input dtype, no astype copy
    padded = padded_len != n
    if padded:
        # Only materialized when n % 128 != 0 (or the slab is tiny).
        flat = jnp.pad(flat, (0, padded_len - n))
    return flat.reshape(rows_arr, LANE), rows_arr, tm, padded


# --------------------------------------------------------------------------
# Wrapper
# --------------------------------------------------------------------------
@functools.partial(jax.jit, static_argnames=("eps", "momentum", "training"))
def tensor_norm(x, weight, bias, running_mean, running_var,
                *, eps=1e-4, momentum=0.1, training=True):
    """Pallas TensorNorm. Returns (out, new_running_mean, new_running_var)."""
    orig_shape = x.shape
    orig_dtype = x.dtype
    n = x.size

    w = jnp.asarray(weight, jnp.float32).reshape(())
    b = jnp.asarray(bias, jnp.float32).reshape(())
    rm = jnp.asarray(running_mean, jnp.float32).reshape(())
    rv = jnp.asarray(running_var, jnp.float32).reshape(())
    n_f = jnp.float32(n)

    pad_bytes = _padded_f32_bytes(orig_shape)
    fused_ok = (pad_bytes is not None) and (pad_bytes <= FUSED_PAD_BYTES) and n >= 1

    if training:
        if fused_ok:
            out, mean, biased_var = _fused_train(x, w, b, n, eps)
        else:
            x2d, rows_arr, tm, padded = _to_slab(x, n)
            total, totsq = _global_sums(x2d, rows_arr, tm)
            mean = total / n_f
            # TODO(synk): E[x^2]-mean^2 loses digits when |mean| >> std; a
            #             Welford/Chan merge would be safer for offset-heavy data.
            biased_var = jnp.maximum(totsq / n_f - mean * mean, 0.0)
            scale = jax.lax.rsqrt(biased_var + jnp.float32(eps)) * w
            shift = b - mean * scale
            out2d = _normalize(x2d, rows_arr, tm, scale, shift, orig_dtype)
            if padded:
                out = out2d.reshape(-1)[:n].reshape(orig_shape)
            else:
                out = out2d.reshape(orig_shape)   # free bitcast, no slice copy

        # n == 1 clamps the unbiased factor to 1 (PyTorch would give NaN/undef).
        unbias_var = biased_var * (n_f / jnp.maximum(n_f - 1.0, 1.0))
        new_rm = (1.0 - momentum) * rm + momentum * mean
        new_rv = (1.0 - momentum) * rv + momentum * unbias_var
        return out, new_rm.reshape(1), new_rv.reshape(1)

    # Eval branch: normalize with running stats (affine only).
    scale = jax.lax.rsqrt(rv + jnp.float32(eps)) * w
    shift = b - rm * scale
    if fused_ok:
        out = _fused_affine(x, scale, shift)
    else:
        x2d, rows_arr, tm, padded = _to_slab(x, n)
        out2d = _normalize(x2d, rows_arr, tm, scale, shift, orig_dtype)
        if padded:
            out = out2d.reshape(-1)[:n].reshape(orig_shape)
        else:
            out = out2d.reshape(orig_shape)
    return out, rm.reshape(1), rv.reshape(1)


# --------------------------------------------------------------------------
# Self-test
# --------------------------------------------------------------------------
if __name__ == "__main__":
    eps, momentum = 1e-4, 0.1

    def _ref_train(x, w, b, rm, rv):
        m = x.mean()
        vb = jnp.mean((x - m) ** 2)
        vu = vb * x.size / (x.size - 1)
        out = (x - m) / jnp.sqrt(vb + eps) * w[0] + b[0]
        return out, (1 - momentum) * rm + momentum * m, \
            (1 - momentum) * rv + momentum * vu

    # --- Test 1: small NCHW input (fused single-kernel path) ----------------
    x = jax.random.normal(jax.random.PRNGKey(0), (2, 4, 16, 16), jnp.float32)
    weight = jnp.ones((1,), jnp.float32)
    bias = jnp.zeros((1,), jnp.float32)
    running_mean = jnp.zeros((1,), jnp.float32)
    running_var = jnp.ones((1,), jnp.float32)

    out, new_rm, new_rv = tensor_norm(
        x, weight, bias, running_mean, running_var,
        eps=eps, momentum=momentum, training=True)
    jax.block_until_ready((out, new_rm, new_rv))

    out_ref, rm_ref, rv_ref = _ref_train(x, weight, bias,
                                         running_mean, running_var)
    assert jnp.allclose(out, out_ref, rtol=1e-5, atol=1e-5)
    assert jnp.allclose(new_rm, rm_ref, rtol=1e-5, atol=1e-5)
    assert jnp.allclose(new_rv, rv_ref, rtol=1e-5, atol=1e-5)

    # Eval branch (fused affine path).
    out_e, _, _ = tensor_norm(
        x, weight, bias, running_mean, running_var,
        eps=eps, momentum=momentum, training=False)
    jax.block_until_ready(out_e)
    out_e_ref = (x - running_mean[0]) / jnp.sqrt(running_var[0] + eps) \
        * weight[0] + bias[0]
    assert jnp.allclose(out_e, out_e_ref, rtol=1e-5, atol=1e-5)

    # --- Test 2: large n%128==0 tensor -> 2-pass path, multi-block + ragged
    #     last block (and 2-core split on 2-TC chips). ------------------------
    x2 = jax.random.normal(jax.random.PRNGKey(1), (4, 8, 256, 257), jnp.float32)
    w2 = jnp.full((1,), 1.5, jnp.float32)
    b2 = jnp.full((1,), -0.25, jnp.float32)
    rm2 = jnp.full((1,), 0.2, jnp.float32)
    rv2 = jnp.full((1,), 0.9, jnp.float32)
    out2, nrm2, nrv2 = tensor_norm(x2, w2, b2, rm2, rv2,
                                   eps=eps, momentum=momentum, training=True)
    jax.block_until_ready((out2, nrm2, nrv2))
    out2_ref, rm2_ref, rv2_ref = _ref_train(x2, w2, b2, rm2, rv2)
    assert jnp.allclose(out2, out2_ref, rtol=1e-4, atol=1e-4)
    assert jnp.allclose(nrm2, rm2_ref, rtol=1e-4, atol=1e-5)
    assert jnp.allclose(nrv2, rv2_ref, rtol=1e-4, atol=1e-4)

    # --- Test 3: tiny tensor with n % 128 != 0 -> fused path, no pad at all --
    x3 = jax.random.normal(jax.random.PRNGKey(2), (2, 3, 7, 11), jnp.float32)
    out3, nrm3, nrv3 = tensor_norm(x3, weight, bias, running_mean, running_var,
                                   eps=eps, momentum=momentum, training=True)
    jax.block_until_ready((out3, nrm3, nrv3))
    out3_ref, rm3_ref, rv3_ref = _ref_train(x3, weight, bias,
                                            running_mean, running_var)
    assert jnp.allclose(out3, out3_ref, rtol=1e-5, atol=1e-5)
    assert jnp.allclose(nrm3, rm3_ref, rtol=1e-5, atol=1e-5)
    assert jnp.allclose(nrv3, rv3_ref, rtol=1e-5, atol=1e-5)

    # --- Test 4: large ragged tensor (n % 128 != 0) -> 2-pass pad fallback ---
    x4 = jax.random.normal(jax.random.PRNGKey(3), (3, 7, 513, 129), jnp.float32)
    out4, nrm4, nrv4 = tensor_norm(x4, w2, b2, rm2, rv2,
                                   eps=eps, momentum=momentum, training=True)
    jax.block_until_ready((out4, nrm4, nrv4))
    out4_ref, rm4_ref, rv4_ref = _ref_train(x4, w2, b2, rm2, rv2)
    assert jnp.allclose(out4, out4_ref, rtol=1e-4, atol=1e-4)
    assert jnp.allclose(nrm4, rm4_ref, rtol=1e-4, atol=1e-5)
    assert jnp.allclose(nrv4, rv4_ref, rtol=1e-4, atol=1e-4)

    print("KERNEL_OK")
</pallas_src>

<mosaic_0001>
module attributes {stable_mosaic.version = 11 : i64} {
  func.func @_fused_train_kernel(%arg0: memref<1x1xf32, #tpu.memory_space<smem>>, %arg1: memref<1x1xf32, #tpu.memory_space<smem>>, %arg2: memref<2x4x16x16xf32, #tpu.memory_space<vmem>>, %arg3: memref<2x4x16x16xf32, #tpu.memory_space<vmem>>, %arg4: memref<1x1xf32, #tpu.memory_space<smem>>, %arg5: memref<1x1xf32, #tpu.memory_space<smem>>) attributes {dimension_semantics = [], scalar_prefetch = 0 : i64, scratch_operands = 0 : i64, tpu.core_type = #tpu.core_type<tc>} {
    %c0 = arith.constant 0 : index
    %c0_0 = arith.constant 0 : index
    %c0_1 = arith.constant 0 : index
    %c0_2 = arith.constant 0 : index
    %0 = vector.load %arg2[%c0, %c0_0, %c0_1, %c0_2] : memref<2x4x16x16xf32, #tpu.memory_space<vmem>>, vector<2x4x16x16xf32>
    %1 = vector.shape_cast %0 : vector<2x4x16x16xf32> to vector<1x2x4x16x16xf32>
    %cst = arith.constant dense<0.000000e+00> : vector<1xf32>
    %2 = vector.multi_reduction <add>, %1, %cst [1, 2, 3, 4] : vector<1x2x4x16x16xf32> to vector<1xf32>
    %3 = vector.shape_cast %2 : vector<1xf32> to vector<1x1x1x1x1xf32>
    %4 = vector.extract %3[0, 0, 0, 0, 0] : f32 from vector<1x1x1x1x1xf32>
    %cst_3 = arith.constant 2.048000e+03 : f32
    %5 = arith.divf %4, %cst_3 : f32
    %6 = arith.mulf %0, %0 : vector<2x4x16x16xf32>
    %7 = vector.shape_cast %6 : vector<2x4x16x16xf32> to vector<1x2x4x16x16xf32>
    %cst_4 = arith.constant dense<0.000000e+00> : vector<1xf32>
    %8 = vector.multi_reduction <add>, %7, %cst_4 [1, 2, 3, 4] : vector<1x2x4x16x16xf32> to vector<1xf32>
    %9 = vector.shape_cast %8 : vector<1xf32> to vector<1x1x1x1x1xf32>
    %10 = vector.extract %9[0, 0, 0, 0, 0] : f32 from vector<1x1x1x1x1xf32>
    %cst_5 = arith.constant 2.048000e+03 : f32
    %11 = arith.divf %10, %cst_5 : f32
    %12 = arith.mulf %5, %5 : f32
    %13 = arith.subf %11, %12 : f32
    %cst_6 = arith.constant 0.000000e+00 : f32
    %14 = arith.maximumf %13, %cst_6 : f32
    %cst_7 = arith.constant 9.99999974E-5 : f32
    %15 = arith.addf %14, %cst_7 : f32
    %16 = math.rsqrt %15 : f32
    %c0_8 = arith.constant 0 : index
    %c0_9 = arith.constant 0 : index
    %17 = memref.load %arg0[%c0_8, %c0_9] : memref<1x1xf32, #tpu.memory_space<smem>>
    %18 = arith.mulf %16, %17 : f32
    %c0_10 = arith.constant 0 : index
    %c0_11 = arith.constant 0 : index
    %19 = memref.load %arg1[%c0_10, %c0_11] : memref<1x1xf32, #tpu.memory_space<smem>>
    %20 = arith.mulf %5, %18 : f32
    %21 = arith.subf %19, %20 : f32
    %22 = vector.broadcast %18 : f32 to vector<2x4x16x16xf32>
    %23 = arith.mulf %0, %22 : vector<2x4x16x16xf32>
    %24 = vector.broadcast %21 : f32 to vector<2x4x16x16xf32>
    %25 = arith.addf %23, %24 : vector<2x4x16x16xf32>
    %c0_12 = arith.constant 0 : index
    %c0_13 = arith.constant 0 : index
    %c0_14 = arith.constant 0 : index
    %c0_15 = arith.constant 0 : index
    %26 = vector.load %arg3[%c0_12, %c0_13, %c0_14, %c0_15] : memref<2x4x16x16xf32, #tpu.memory_space<vmem>>, vector<2x4x16x16xf32>
    tpu.vector_store %arg3[%c0_12, %c0_13, %c0_14, %c0_15], %25 {strides = array<i32>} : memref<2x4x16x16xf32, #tpu.memory_space<vmem>>, vector<2x4x16x16xf32>,
    %c0_16 = arith.constant 0 : index
    %c0_17 = arith.constant 0 : index
    %27 = memref.load %arg4[%c0_16, %c0_17] : memref<1x1xf32, #tpu.memory_space<smem>>
    memref.store %5, %arg4[%c0_16, %c0_17] : memref<1x1xf32, #tpu.memory_space<smem>>
    %c0_18 = arith.constant 0 : index
    %c0_19 = arith.constant 0 : index
    %28 = memref.load %arg5[%c0_18, %c0_19] : memref<1x1xf32, #tpu.memory_space<smem>>
    memref.store %14, %arg5[%c0_18, %c0_19] : memref<1x1xf32, #tpu.memory_space<smem>>
    return
  }
}

</mosaic_0001>

<bundles_post_ra>
// kernel: tensor_norm.1
= control target key start
LH: loop header
LB: loop body
LE: loop exit
PB: predicated region body
PF: predicated region fallthrough
CT: control target
= control target key end

     0   :  { %13 = vsyncpa [#allocation5], 0  ;;  %s604_s0 = inlined_call_operand.<no memory space> [shape: f32[1,1], index: 0, kind: input, shape index: {}]   ;;  %s605_s1 = inlined_call_operand.<no memory space> [shape: f32[1,1], index: 1, kind: input, shape index: {}]   ;;  %s606_s2 = inlined_call_operand.hbm [shape: f32[2,4,16,16], index: 2, kind: input, shape index: {}]   ;;  %s607_s3 = inlined_call_operand.hbm [shape: f32[2,4,16,16], index: 3, kind: output, shape index: {0}]   ;;  %s608_s4 = inlined_call_operand.hbm [shape: f32[1,1], index: 4, kind: output, shape index: {1}]   ;;  %s609_s5 = inlined_call_operand.hbm [shape: f32[1,1], index: 5, kind: output, shape index: {2}]  }
   0x1   :  { %14 = vsyncpa [#allocation6], 0 }
   0x2   :  { %15 = vsyncpa [#allocation7], 0 }
   0x3   :  { %16 = vsyncpa [#allocation11], 0  ;;  %s25_s20 = sshll.u32 %s606_s2, 4  ;;  %s392_s21 = smov [#allocation4]   ;;  %s26_s20 = int_to_ptr.hbm [resolvable:$true] %s25_s20 }
   0x4   :  { %s27_s22 = sshll.u32 %s392_s21, 4  ;;  %s393_s23 = smov 128   ;;  %s28_s22 = int_to_ptr.vmem [resolvable:$true] %s27_s22 }
   0x5   :  { %s394_s24 = smov 8  }
   0x6   :  { %33 = dma.hbm_to_vmem [thread:$0]  %s26_s20, 2048, %s28_s22, [#allocation5], %s393_s23, %s393_s23, %s394_s24  }
   0x7   :  { %384 = dma.done.wait [#allocation5], 2048  }
   0x8   :  { %385 = vsyncadd [#allocation5], 4294965248  ;;  %vm54_vm0 = vcmask 130048   ;;  %v436_v0 = vld [vmem:[#allocation4] sm:$0xff]  ;;  %v438_v1 = vld [vmem:[#allocation4 + $0x8] sm:$0xff]  ;;  %s262_s26 = sshll.u32 %s608_s4, 4  ;;  %s263_s26 = int_to_ptr.hbm [resolvable:$true] %s262_s26 }
   0x9   :  { %v440_v2 = vld [vmem:[#allocation4 + $0x10] sm:$0xff]  ;;  %v442_v3 = vld [vmem:[#allocation4 + $0x18] sm:$0xff]  ;;  %v55_v4 = vsel %vm54_vm0, %v436_v0, 0.0  ;;  %v56_v5 = vsel %vm54_vm0, %v438_v1, 0.0  ;;  %v450_v7 = vld [vmem:[#allocation4 + $0x20] sm:$0xff]  ;;  %v104_v15 = vmul.f32 %v436_v0, %v436_v0  ;;  %v105_v16 = vmul.f32 %v438_v1, %v438_v1  ;;  %s396_s30 = smov [#allocation9]  }
   0xa   :  { %v58_v6 = vsel %vm54_vm0, %v440_v2, 0.0  ;;  %v57_v8 = vadd.f32 %v56_v5, %v55_v4  ;;  %v60_v9 = vsel %vm54_vm0, %v442_v3, 0.0  ;;  %v454_v10 = vld [vmem:[#allocation4 + $0x28] sm:$0xff]  ;;  %v62_v12 = vsel %vm54_vm0, %v450_v7, 0.0  ;;  %v458_v13 = vld [vmem:[#allocation4 + $0x30] sm:$0xff]  ;;  %v468_v19 = vld [vmem:[#allocation4 + $0x38] sm:$0xff] }
   0xb   :  { %v106_v17 = vmul.f32 %v440_v2, %v440_v2  ;;  %v64_v18 = vsel %vm54_vm0, %v454_v10, 0.0  ;;  %v107_v21 = vmul.f32 %v442_v3, %v442_v3  ;;  %v66_v22 = vsel %vm54_vm0, %v458_v13, 0.0  ;;  %v476_v24 = vld [vmem:[#allocation4 + $0x40] sm:$0xff]  ;;  %v483_v31 = vld [vmem:[#allocation4 + $0x48] sm:$0xff]  ;;  %v490_v37 = vld [vmem:[#allocation4 + $0x50] sm:$0xff]  ;;  %s271_s11 = sshll.u32 %s609_s5, 4  ;;  %s272_s11 = int_to_ptr.hbm [resolvable:$true] %s271_s11 }
   0xc   :  { %v59_v11 = vadd.f32 %v58_v6, %v57_v8  ;;  %v108_v23 = vmul.f32 %v450_v7, %v450_v7  ;;  %v120_v26 = vsel %vm54_vm0, %v104_v15, 0.0  ;;  %v121_v27 = vsel %vm54_vm0, %v105_v16, 0.0  ;;  %v497_v43 = vld [vmem:[#allocation4 + $0x58] sm:$0xff]  ;;  %v504_v49 = vld [vmem:[#allocation4 + $0x60] sm:$0xff]  ;;  %v511_v55 = vld [vmem:[#allocation4 + $0x68] sm:$0xff]  ;;  %s397_s4 = smov 0.0  }
   0xd   :  { %v123_v28 = vsel %vm54_vm0, %v106_v17, 0.0  ;;  %v68_v29 = vsel %vm54_vm0, %v468_v19, 0.0  ;;  %v122_v30 = vadd.f32 %v121_v27, %v120_v26  ;;  %v109_v33 = vmul.f32 %v454_v10, %v454_v10  ;;  %v518_v61 = vld [vmem:[#allocation4 + $0x70] sm:$0xff]  ;;  %v525_v8 = vld [vmem:[#allocation4 + $0x78] sm:$0xff]  ;;  %s398_s15 = smov [#allocation10]  }
   0xe   :  { %v61_v14 = vadd.f32 %v60_v9, %v59_v11  ;;  %v125_v34 = vsel %vm54_vm0, %v107_v21, 0.0  ;;  %v70_v35 = vsel %vm54_vm0, %v476_v24, 0.0  ;;  %v110_v39 = vmul.f32 %v458_v13, %v458_v13 }
   0xf   :  { %v124_v36 = vadd.f32 %v123_v28, %v122_v30  ;;  %v127_v40 = vsel %vm54_vm0, %v108_v23, 0.0  ;;  %v72_v41 = vsel %vm54_vm0, %v483_v31, 0.0  ;;  %v111_v45 = vmul.f32 %v468_v19, %v468_v19 }
  0x10   :  { %v63_v20 = vadd.f32 %v62_v12, %v61_v14  ;;  %v129_v46 = vsel %vm54_vm0, %v109_v33, 0.0  ;;  %v74_v47 = vsel %vm54_vm0, %v490_v37, 0.0  ;;  %v112_v51 = vmul.f32 %v476_v24, %v476_v24 }
  0x11   :  { %v126_v42 = vadd.f32 %v125_v34, %v124_v36  ;;  %v131_v52 = vsel %vm54_vm0, %v110_v39, 0.0  ;;  %v76_v53 = vsel %vm54_vm0, %v497_v43, 0.0  ;;  %v113_v57 = vmul.f32 %v483_v31, %v483_v31 }
  0x12   :  { %v65_v25 = vadd.f32 %v64_v18, %v63_v20  ;;  %v133_v58 = vsel %vm54_vm0, %v111_v45, 0.0  ;;  %v78_v59 = vsel %vm54_vm0, %v504_v49, 0.0  ;;  %v114_v63 = vmul.f32 %v490_v37, %v490_v37 }
  0x13   :  { %v128_v48 = vadd.f32 %v127_v40, %v126_v42  ;;  %v135_v4 = vsel %vm54_vm0, %v112_v51, 0.0  ;;  %v80_v5 = vsel %vm54_vm0, %v511_v55, 0.0  ;;  %v115_v11 = vmul.f32 %v497_v43, %v497_v43 }
  0x14   :  { %v67_v32 = vadd.f32 %v66_v22, %v65_v25  ;;  %v137_v12 = vsel %vm54_vm0, %v113_v57, 0.0  ;;  %v82_v14 = vsel %vm54_vm0, %v518_v61, 0.0  ;;  %v116_v17 = vmul.f32 %v504_v49, %v504_v49 }
  0x15   :  { %v130_v54 = vadd.f32 %v129_v46, %v128_v48  ;;  %v139_v18 = vsel %vm54_vm0, %v114_v63, 0.0  ;;  %v84_v20 = vsel %vm54_vm0, %v525_v8, 0.0  ;;  %v117_v23 = vmul.f32 %v511_v55, %v511_v55 }
  0x16   :  { %v69_v38 = vadd.f32 %v68_v29, %v67_v32  ;;  %v141_v25 = vsel %vm54_vm0, %v115_v11, 0.0  ;;  %v118_v28 = vmul.f32 %v518_v61, %v518_v61  ;;  %v143_v29 = vsel %vm54_vm0, %v116_v17, 0.0 }
  0x17   :  { %v132_v60 = vadd.f32 %v131_v52, %v130_v54  ;;  %v119_v32 = vmul.f32 %v525_v8, %v525_v8  ;;  %v145_v33 = vsel %vm54_vm0, %v117_v23, 0.0 }
  0x18   :  { %v71_v44 = vadd.f32 %v70_v35, %v69_v38  ;;  %v147_v35 = vsel %vm54_vm0, %v118_v28, 0.0 }
  0x19   :  { %v134_v6 = vadd.f32 %v133_v58, %v132_v60  ;;  %v149_v38 = vsel %vm54_vm0, %v119_v32, 0.0 }
  0x1a   :  { %v73_v50 = vadd.f32 %v72_v41, %v71_v44  ;;  %v395_v41 = vmov 2048.0  }
  0x1b   :  { %v136_v15 = vadd.f32 %v135_v4, %v134_v6  ;;  %308 = vrcp.f32 %v395_v41 }
  0x1c   :  { %v75_v56 = vadd.f32 %v74_v47, %v73_v50 }
  0x1d   :  { %v138_v21 = vadd.f32 %v137_v12, %v136_v15 }
  0x1e   :  { %v77_v62 = vadd.f32 %v76_v53, %v75_v56 }
  0x1f   :  { %v140_v26 = vadd.f32 %v139_v18, %v138_v21 }
  0x20   :  { %v79_v9 = vadd.f32 %v78_v59, %v77_v62 }
  0x21   :  { %v142_v30 = vadd.f32 %v141_v25, %v140_v26  ;;  %v309_v42 = vpop.eup %308 }
  0x22   :  { %v81_v16 = vadd.f32 %v80_v5, %v79_v9  ;;  %v96_v44 = vmul.f32 2048.0, %v309_v42  ;;  %vm100_vm1 = vweird.f32 %v309_v42 }
  0x23   :  { %v144_v34 = vadd.f32 %v143_v29, %v142_v30 }
  0x24   :  { %v83_v22 = vadd.f32 %v82_v14, %v81_v16  ;;  %v97_v45 = vsub.f32 1.0, %v96_v44 }
  0x25   :  { %v146_v36 = vadd.f32 %v145_v33, %v144_v34 }
  0x26   :  { %v85_v27 = vadd.f32 %v84_v20, %v83_v22  ;;  %v98_v50 = vmul.f32 %v309_v42, %v97_v45 }
  0x27   :  { %v148_v39 = vadd.f32 %v147_v35, %v146_v36 }
  0x28   :  { %86 = vadd.xlane.f32.xlu0 %v85_v27  ;;  %v99_v53 = vadd.f32 %v309_v42, %v98_v50 }
  0x29   :  { %v150_v40 = vadd.f32 %v149_v38, %v148_v39 }
  0x2a   :  { %v101_v59 = vsel %vm100_vm1, %v309_v42, %v99_v53 }
  0x30   :  { %151 = vadd.xlane.f32.xlu0 %v150_v40 }
  0x9b   :  { %v87_v46 = vpop.xlane.xlu0 %86 }
  0x9c   :  { %v88_v47 = vrot.slane %v87_v46, 4 }
  0x9e   :  { %v89_v48 = vadd.f32 %v88_v47, %v87_v46 }
  0xa0   :  { %v90_v51 = vrot.slane %v89_v48, 2 }
  0xa2   :  { %v91_v52 = vadd.f32 %v90_v51, %v89_v48 }
  0xa3   :  { %v152_v54 = vpop.xlane.xlu0 %151 }
  0xa4   :  { %v92_v56 = vrot.slane %v91_v52, 1  ;;  %v153_v57 = vrot.slane %v152_v54, 4 }
  0xa6   :  { %v93_v58 = vadd.f32 %v92_v56, %v91_v52  ;;  %v154_v60 = vadd.f32 %v153_v57, %v152_v54 }
  0xa8   :  { %292 = vpush %v93_v58  ;;  %v155_v62 = vrot.slane %v154_v60, 2 }
  0xa9   :  { %294 = vpush %v101_v59 }
  0xaa   :  { %v156_v63 = vadd.f32 %v155_v62, %v154_v60 }
  0xac   :  { %v157_v4 = vrot.slane %v156_v63, 1 }
  0xae   :  { %v158_v5 = vadd.f32 %v157_v4, %v156_v63 }
  0xb0   :  { %296 = vpush %v158_v5 }
  0xd9   :  { %s293_s27 = spop %292 }
  0xda   :  { %s295_s28 = spop %294 }
  0xdb   :  { %s551_s29 = smul.f32 %s295_s28, %s293_s27 }
  0xdd   :  { %241 = sst [smem:[#allocation9]] %s551_s29  ;;  %s169_s7 = smul.f32 %s551_s29, %s551_s29 }
  0xde   :  { %265 = dma.smem_to_hbm %s396_s30, 16, %s263_s26, [#allocation7]  }
  0xdf   :  { %s250_s26 = sshll.u32 %s607_s3, 4  ;;  %s251_s26 = int_to_ptr.hbm [resolvable:$true] %s250_s26 }
  0xe1   :  { %s297_s6 = spop %296 }
  0xe2   :  { %s168_s8 = smul.f32 %s297_s6, %s295_s28 }
  0xe4   :  { %s170_s12 = ssub.f32 %s168_s8, %s169_s7 }
  0xe6   :  { %s171_s13 = smax.f32 %s397_s4, %s170_s12 }
  0xe7   :  { %s172_s14 = sadd.f32 0.0001, %s171_s13 }
  0xe8   :  { %243 = sst [smem:[#allocation10]] %s171_s13 }
  0xe9   :  { %v173_v6 = vstv %s172_s14  ;;  %274 = dma.smem_to_hbm %s398_s15, 16, %s272_s11, [#allocation11]  }
  0xea   :  { %310 = vrsqrt.f32 %v173_v6  ;;  %vm180_vm3 = vweird.f32 %v173_v6 }
  0xf0   :  { %v311_v9 = vpop.eup %310 }
  0xf1   :  { %v175_v11 = vmul.f32 %v311_v9, %v173_v6  ;;  %vm181_vm2 = vweird.f32 %v311_v9 }
  0xf2   :  { %vm182_vm4 = vmor %vm180_vm3, %vm181_vm2 }
  0xf3   :  { %v176_v12 = vmul.f32 %v311_v9, %v175_v11 }
  0xf5   :  { %v177_v14 = vmul.f32 0.5, %v176_v12 }
  0xf7   :  { %v178_v15 = vsub.f32 1.5, %v177_v14 }
  0xf9   :  { %v179_v16 = vmul.f32 %v311_v9, %v178_v15 }
  0xfb   :  { %v183_v17 = vsel %vm182_vm4, %v311_v9, %v179_v16 }
  0xfc   :  { %298 = vpush %v183_v17 }
 0x12d   :  { %s299_s5 = spop %298 }
 0x12e   :  { %s186_s18 = smul.f32 %s299_s5, %s604_s0  ;;  %s399_s0 = smov [#allocation8]  }
 0x130   :  { %s188_s19 = smul.f32 %s186_s18, %s551_s29  ;;  %v190_v18 = vstv %s186_s18 }
 0x131   :  { %v191_v20 = vmul.f32 %v190_v18, %v436_v0  ;;  %v192_v21 = vmul.f32 %v190_v18, %v438_v1  ;;  %v193_v22 = vmul.f32 %v190_v18, %v440_v2  ;;  %v194_v23 = vmul.f32 %v190_v18, %v442_v3 }
 0x132   :  { %s189_s22 = ssub.f32 %s605_s1, %s188_s19  ;;  %v195_v26 = vmul.f32 %v190_v18, %v450_v7  ;;  %v196_v30 = vmul.f32 %v190_v18, %v454_v10  ;;  %v197_v33 = vmul.f32 %v190_v18, %v458_v13  ;;  %v198_v0 = vmul.f32 %v190_v18, %v468_v19  ;;  %s248_s1 = sshll.u32 %s399_s0, 4  ;;  %s249_s1 = int_to_ptr.vmem [resolvable:$true] %s248_s1 }
 0x133   :  { %v199_v2 = vmul.f32 %v190_v18, %v476_v24  ;;  %v200_v7 = vmul.f32 %v190_v18, %v483_v31  ;;  %v201_v10 = vmul.f32 %v190_v18, %v490_v37  ;;  %v202_v19 = vmul.f32 %v190_v18, %v497_v43 }
 0x134   :  { %v207_v25 = vstv %s189_s22  ;;  %v203_v24 = vmul.f32 %v190_v18, %v504_v49  ;;  %v204_v31 = vmul.f32 %v190_v18, %v511_v55  ;;  %v205_v37 = vmul.f32 %v190_v18, %v518_v61 }
 0x135   :  { %v208_v27 = vadd.f32 %v207_v25, %v191_v20  ;;  %v209_v28 = vadd.f32 %v207_v25, %v192_v21  ;;  %v210_v29 = vadd.f32 %v207_v25, %v193_v22  ;;  %v211_v32 = vadd.f32 %v207_v25, %v194_v23 }
 0x136   :  { %v212_v34 = vadd.f32 %v207_v25, %v195_v26  ;;  %v213_v1 = vadd.f32 %v207_v25, %v196_v30  ;;  %v214_v3 = vadd.f32 %v207_v25, %v197_v33  ;;  %v215_v35 = vadd.f32 %v207_v25, %v198_v0 }
 0x137   :  { %224 = vst.msk [vmem:[#allocation8] sm:$0xff] %vm54_vm0, %v208_v27  ;;  %v216_v13 = vadd.f32 %v207_v25, %v199_v2  ;;  %v217_v36 = vadd.f32 %v207_v25, %v200_v7  ;;  %v218_v38 = vadd.f32 %v207_v25, %v201_v10  ;;  %v219_v39 = vadd.f32 %v207_v25, %v202_v19 }
 0x138   :  { %225 = vst.msk [vmem:[#allocation8 + $0x8] sm:$0xff] %vm54_vm0, %v209_v28  ;;  %v220_v40 = vadd.f32 %v207_v25, %v203_v24  ;;  %v206_v43 = vmul.f32 %v190_v18, %v525_v8  ;;  %v221_v41 = vadd.f32 %v207_v25, %v204_v31  ;;  %v222_v42 = vadd.f32 %v207_v25, %v205_v37 }
 0x139   :  { %226 = vst.msk [vmem:[#allocation8 + $0x10] sm:$0xff] %vm54_vm0, %v210_v29 }
 0x13a   :  { %227 = vst.msk [vmem:[#allocation8 + $0x18] sm:$0xff] %vm54_vm0, %v211_v32  ;;  %v223_v49 = vadd.f32 %v207_v25, %v206_v43 }
 0x13b   :  { %228 = vst.msk [vmem:[#allocation8 + $0x20] sm:$0xff] %vm54_vm0, %v212_v34 }
 0x13c   :  { %229 = vst.msk [vmem:[#allocation8 + $0x28] sm:$0xff] %vm54_vm0, %v213_v1 }
 0x13d   :  { %230 = vst.msk [vmem:[#allocation8 + $0x30] sm:$0xff] %vm54_vm0, %v214_v3 }
 0x13e   :  { %231 = vst.msk [vmem:[#allocation8 + $0x38] sm:$0xff] %vm54_vm0, %v215_v35 }
 0x13f   :  { %232 = vst.msk [vmem:[#allocation8 + $0x40] sm:$0xff] %vm54_vm0, %v216_v13 }
 0x140   :  { %233 = vst.msk [vmem:[#allocation8 + $0x48] sm:$0xff] %vm54_vm0, %v217_v36 }
 0x141   :  { %234 = vst.msk [vmem:[#allocation8 + $0x50] sm:$0xff] %vm54_vm0, %v218_v38 }
 0x142   :  { %235 = vst.msk [vmem:[#allocation8 + $0x58] sm:$0xff] %vm54_vm0, %v219_v39 }
 0x143   :  { %236 = vst.msk [vmem:[#allocation8 + $0x60] sm:$0xff] %vm54_vm0, %v220_v40 }
 0x144   :  { %237 = vst.msk [vmem:[#allocation8 + $0x68] sm:$0xff] %vm54_vm0, %v221_v41 }
 0x145   :  { %238 = vst.msk [vmem:[#allocation8 + $0x70] sm:$0xff] %vm54_vm0, %v222_v42 }
 0x146   :  { %239 = vst.msk [vmem:[#allocation8 + $0x78] sm:$0xff] %vm54_vm0, %v223_v49 }
 0x147   :  { %256 = dma.vmem_to_hbm [thread:$0]  %s249_s1, 2048, %s251_s26, [#allocation6], %s393_s23, %s393_s23, %s394_s24  }
 0x148   :  { %386 = dma.done.wait [#allocation6], 2048  }
 0x149   :  { %387 = vsyncadd [#allocation6], 4294965248 }
 0x14a   :  { %388 = dma.done.wait [#allocation7], 16  }
 0x14b   :  { %389 = vsyncadd [#allocation7], 4294967280 }
 0x14c   :  { %390 = dma.done.wait [#allocation11], 16  }
 0x14d   :  { %391 = vsyncadd [#allocation11], 4294967280 }
 0x14e   :  { %287 = sfence }
 0x14f   :  { %288 = vsyncpa [#allocation5], 1 }
 0x150   :  { %289 = vsyncpa [#allocation6], 1 }
 0x151   :  { %290 = vsyncpa [#allocation7], 1 }
 0x152   :  { %291 = vsyncpa [#allocation11], 1 }

</bundles_post_ra>
